<compile_context>
chip_gen: v7x
topology: tpu7x:2x2x1
jax: 0.10.0
libtpu: 0.0.40
codegen_flags: <defaults>
</compile_context>

<pallas_src>
import functools

import jax
import jax.numpy as jnp
from jax.experimental import pallas as pl
from jax.experimental.pallas import tpu as pltpu


TILE_B = 1024          # max batch rows per grid step


def _round_up(n, m):
    return ((n + m - 1) // m) * m


def _pick_tile(batch, tile_b):
    """Batch tile: multiple of 8 (sublane), <= tile_b, and whenever the batch
    is big enough keep >= 2 grid steps so the "parallel" axis can be sharded
    across v7x's 2 TensorCores."""
    t = max(8, min(tile_b, _round_up(batch, 8)))
    if batch >= 16 and pl.cdiv(batch, t) < 2:
        t = max(8, _round_up(pl.cdiv(batch, 2), 8))
    return t


def dqn_kernel(x_ref, w1_ref, b1_ref, w2_ref, b2_ref, o_ref, *, matmul_dtype):
    # Hidden layer: x @ W1 + b1, ReLU   (MXU matmul, f32 accumulate).
    x = x_ref[...]
    if x.dtype != matmul_dtype:          # in-VMEM cast; no extra HBM pass
        x = x.astype(matmul_dtype)
    h = jnp.dot(x, w1_ref[...], preferred_element_type=jnp.float32)
    h = jnp.maximum(h + b1_ref[...], 0.0)                       # (tile_b, H)

    # Output layer: h @ W2 + b2 (unpadded action dim).
    logits = jnp.dot(h.astype(matmul_dtype), w2_ref[...],
                     preferred_element_type=jnp.float32)
    logits = logits + b2_ref[...]                               # (tile_b, A)

    # Numerically stable softmax over the action axis (dim=1).
    m = jnp.max(logits, axis=1, keepdims=True)
    e = jnp.exp(logits - m)
    denom = jnp.sum(e, axis=1, keepdims=True)
    o_ref[...] = (e * pl.reciprocal(denom, approx=True)).astype(o_ref.dtype)


def dqn_forward(x, w1, b1, w2, b2, *, tile_b=TILE_B,
                matmul_dtype=jnp.bfloat16):
    """softmax(relu(x @ w1 + b1) @ w2 + b2, axis=1) via a Pallas TPU kernel."""
    B, F = x.shape
    H, A = w2.shape

    # Cast weights once in the wrapper (tiny arrays; avoids per-grid-step
    # casts of the VMEM-resident blocks and halves their footprint for bf16).
    w1c = w1.astype(matmul_dtype)
    w2c = w2.astype(matmul_dtype)
    b1r = jnp.reshape(b1, (1, H)).astype(jnp.float32)
    b2r = jnp.reshape(b2, (1, A)).astype(jnp.float32)

    t = _pick_tile(B, tile_b)
    grid = (pl.cdiv(B, t),)   # ragged last block handled by Pallas boundary logic

    kernel = functools.partial(dqn_kernel, matmul_dtype=matmul_dtype)
    out = pl.pallas_call(
        kernel,
        out_shape=jax.ShapeDtypeStruct((B, A), jnp.float32),
        grid=grid,
        in_specs=[
            pl.BlockSpec((t, F), lambda i: (i, 0)),   # x: streamed over batch
            pl.BlockSpec((F, H), lambda i: (0, 0)),   # W1: VMEM-resident
            pl.BlockSpec((1, H), lambda i: (0, 0)),   # b1: resident
            pl.BlockSpec((H, A), lambda i: (0, 0)),   # W2: resident
            pl.BlockSpec((1, A), lambda i: (0, 0)),   # b2: resident
        ],
        out_specs=pl.BlockSpec((t, A), lambda i: (i, 0)),   # compact (B, A) out
        compiler_params=pltpu.CompilerParams(
            dimension_semantics=("parallel",)),
    )(x, w1c, b1r, w2c, b2r)
    return out


def init_params(key, input_shape, hidden_size, n_actions):
    k1, k2, k3, k4 = jax.random.split(key, 4)
    # Deterministic synthetic init (PyTorch-like uniform fan-in scaling).
    lim1 = 1.0 / jnp.sqrt(input_shape)
    lim2 = 1.0 / jnp.sqrt(hidden_size)
    w1 = jax.random.uniform(k1, (input_shape, hidden_size), jnp.float32, -lim1, lim1)
    b1 = jax.random.uniform(k2, (1, hidden_size), jnp.float32, -lim1, lim1)
    w2 = jax.random.uniform(k3, (hidden_size, n_actions), jnp.float32, -lim2, lim2)
    b2 = jax.random.uniform(k4, (1, n_actions), jnp.float32, -lim2, lim2)
    return w1, b1, w2, b2


def _reference(x, w1, b1, w2, b2):
    h = jnp.maximum(x @ w1 + jnp.reshape(b1, (1, -1)), 0.0)
    logits = h @ w2 + jnp.reshape(b2, (1, -1))
    return jax.nn.softmax(logits, axis=1)


if __name__ == "__main__":
    # Small shapes consistent with the module: x is (batch, input_shape).
    B, INPUT_SHAPE, HIDDEN, N_ACTIONS = 2, 16, 32, 8

    key = jax.random.PRNGKey(0)
    kx, kp, kbig = jax.random.split(key, 3)
    x = jax.random.normal(kx, (B, INPUT_SHAPE), jnp.float32)
    w1, b1, w2, b2 = init_params(kp, INPUT_SHAPE, HIDDEN, N_ACTIONS)

    # 1) Small-batch call (original module shapes), f32 matmuls: should match
    #    the PyTorch-semantics reference tightly.
    out = dqn_forward(x, w1, b1, w2, b2, matmul_dtype=jnp.float32)
    jax.block_until_ready(out)
    ref = _reference(x, w1, b1, w2, b2)
    assert out.shape == (B, N_ACTIONS)
    assert jnp.allclose(out, ref, atol=2e-3), "small-batch mismatch vs reference"
    assert jnp.allclose(jnp.sum(out, axis=1), 1.0, atol=2e-3)

    # 2) Large batch on the default (bf16-operand, f32-accumulate) fast path:
    #    multi-step parallel grid, compact output writeback.
    B_BIG = 4096
    x_big = jax.random.normal(kbig, (B_BIG, INPUT_SHAPE), jnp.float32)
    out_big = dqn_forward(x_big, w1, b1, w2, b2)
    jax.block_until_ready(out_big)
    ref_big = _reference(x_big, w1, b1, w2, b2)
    assert out_big.shape == (B_BIG, N_ACTIONS)
    assert jnp.allclose(out_big, ref_big, atol=2e-2), "bf16 batched mismatch"
    assert jnp.allclose(jnp.sum(out_big, axis=1), 1.0, atol=5e-3)

    # 3) Ragged batch (not a tile multiple) on the f32 path: exercises the
    #    partial boundary block without any XLA-side padding copy.
    B_RAG = 1000
    x_rag = x_big[:B_RAG]
    out_rag = dqn_forward(x_rag, w1, b1, w2, b2, matmul_dtype=jnp.float32)
    jax.block_until_ready(out_rag)
    ref_rag = _reference(x_rag, w1, b1, w2, b2)
    assert out_rag.shape == (B_RAG, N_ACTIONS)
    assert jnp.allclose(out_rag, ref_rag, atol=2e-3), "ragged-batch mismatch"

    print("KERNEL_OK")
</pallas_src>

<mosaic_0001>
module attributes {stable_mosaic.version = 11 : i64} {
  func.func @dqn_kernel(%arg0: i32, %arg1: memref<8x16xf32, #tpu.memory_space<vmem>>, %arg2: memref<16x32xf32, #tpu.memory_space<vmem>>, %arg3: memref<1x32xf32, #tpu.memory_space<vmem>>, %arg4: memref<32x8xf32, #tpu.memory_space<vmem>>, %arg5: memref<1x8xf32, #tpu.memory_space<vmem>>, %arg6: memref<8x8xf32, #tpu.memory_space<vmem>>) attributes {dimension_semantics = [#tpu.dimension_semantics<parallel>], iteration_bounds = array<i64: 1>, scalar_prefetch = 0 : i64, scratch_operands = 0 : i64, tpu.core_type = #tpu.core_type<tc>, window_params = [{transform_indices = @transform_0, window_bounds = array<i64: 8, 16>}, {pipeline_mode = #tpu.pipeline_mode<synchronous>, transform_indices = @transform_1, window_bounds = array<i64: 16, 32>}, {pipeline_mode = #tpu.pipeline_mode<synchronous>, transform_indices = @transform_2, window_bounds = array<i64: 1, 32>}, {pipeline_mode = #tpu.pipeline_mode<synchronous>, transform_indices = @transform_3, window_bounds = array<i64: 32, 8>}, {pipeline_mode = #tpu.pipeline_mode<synchronous>, transform_indices = @transform_4, window_bounds = array<i64: 1, 8>}, {transform_indices = @transform_5, window_bounds = array<i64: 8, 8>}]} {
    %c0 = arith.constant 0 : index
    %c0_0 = arith.constant 0 : index
    %0 = vector.load %arg1[%c0, %c0_0] : memref<8x16xf32, #tpu.memory_space<vmem>>, vector<8x16xf32>
    %c0_1 = arith.constant 0 : index
    %c0_2 = arith.constant 0 : index
    %1 = vector.load %arg2[%c0_1, %c0_2] : memref<16x32xf32, #tpu.memory_space<vmem>>, vector<16x32xf32>
    %cst = arith.constant dense<0.000000e+00> : vector<8x32xf32>
    %2 = tpu.matmul %0, %1, %cst {dimension_numbers = #tpu.dot_dimension_numbers<[1], [0], [0], [1], [0, 0, 1, 1], [], []>} : vector<8x16xf32>, vector<16x32xf32>, vector<8x32xf32> -> vector<8x32xf32>
    %c0_3 = arith.constant 0 : index
    %c0_4 = arith.constant 0 : index
    %3 = vector.load %arg3[%c0_3, %c0_4] : memref<1x32xf32, #tpu.memory_space<vmem>>, vector<1x32xf32>
    %4 = vector.broadcast %3 : vector<1x32xf32> to vector<8x32xf32>
    %5 = arith.addf %2, %4 : vector<8x32xf32>
    %cst_5 = arith.constant 0.000000e+00 : f32
    %6 = vector.broadcast %cst_5 : f32 to vector<8x32xf32>
    %7 = arith.maximumf %5, %6 : vector<8x32xf32>
    %c0_6 = arith.constant 0 : index
    %c0_7 = arith.constant 0 : index
    %8 = vector.load %arg4[%c0_6, %c0_7] : memref<32x8xf32, #tpu.memory_space<vmem>>, vector<32x8xf32>
    %cst_8 = arith.constant dense<0.000000e+00> : vector<8x8xf32>
    %9 = tpu.matmul %7, %8, %cst_8 {dimension_numbers = #tpu.dot_dimension_numbers<[1], [0], [0], [1], [0, 0, 1, 1], [], []>} : vector<8x32xf32>, vector<32x8xf32>, vector<8x8xf32> -> vector<8x8xf32>
    %c0_9 = arith.constant 0 : index
    %c0_10 = arith.constant 0 : index
    %10 = vector.load %arg5[%c0_9, %c0_10] : memref<1x8xf32, #tpu.memory_space<vmem>>, vector<1x8xf32>
    %11 = vector.broadcast %10 : vector<1x8xf32> to vector<8x8xf32>
    %12 = arith.addf %9, %11 : vector<8x8xf32>
    %cst_11 = arith.constant dense<0xFF800000> : vector<8xf32>
    %13 = vector.multi_reduction <maximumf>, %12, %cst_11 [1] : vector<8x8xf32> to vector<8xf32>
    %14 = vector.shape_cast %13 : vector<8xf32> to vector<8x1xf32>
    %15 = vector.broadcast %14 : vector<8x1xf32> to vector<8x8xf32>
    %16 = arith.subf %12, %15 : vector<8x8xf32>
    %17 = math.exp %16 : vector<8x8xf32>
    %cst_12 = arith.constant dense<0.000000e+00> : vector<8xf32>
    %18 = vector.multi_reduction <add>, %17, %cst_12 [1] : vector<8x8xf32> to vector<8xf32>
    %19 = vector.shape_cast %18 : vector<8xf32> to vector<8x1xf32>
    %20 = tpu.reciprocal %19 {approx = true} : vector<8x1xf32> -> vector<8x1xf32>
    %21 = vector.broadcast %20 : vector<8x1xf32> to vector<8x8xf32>
    %22 = arith.mulf %17, %21 : vector<8x8xf32>
    %c0_13 = arith.constant 0 : index
    %c0_14 = arith.constant 0 : index
    %23 = vector.load %arg6[%c0_13, %c0_14] : memref<8x8xf32, #tpu.memory_space<vmem>>, vector<8x8xf32>
    tpu.vector_store %arg6[%c0_13, %c0_14], %22 {strides = array<i32>} : memref<8x8xf32, #tpu.memory_space<vmem>>, vector<8x8xf32>,
    return
  }
  func.func @transform_0(%arg0: i32) -> (i32, i32) {
    %c0_i32 = arith.constant 0 : i32
    %c0_i32_0 = arith.constant 0 : i32
    return %arg0, %c0_i32 : i32, i32
  }
  func.func @transform_1(%arg0: i32) -> (i32, i32) {
    %c0_i32 = arith.constant 0 : i32
    %c0_i32_0 = arith.constant 0 : i32
    %c0_i32_1 = arith.constant 0 : i32
    return %c0_i32, %c0_i32_0 : i32, i32
  }
  func.func @transform_2(%arg0: i32) -> (i32, i32) {
    %c0_i32 = arith.constant 0 : i32
    %c0_i32_0 = arith.constant 0 : i32
    %c0_i32_1 = arith.constant 0 : i32
    return %c0_i32, %c0_i32_0 : i32, i32
  }
  func.func @transform_3(%arg0: i32) -> (i32, i32) {
    %c0_i32 = arith.constant 0 : i32
    %c0_i32_0 = arith.constant 0 : i32
    %c0_i32_1 = arith.constant 0 : i32
    return %c0_i32, %c0_i32_0 : i32, i32
  }
  func.func @transform_4(%arg0: i32) -> (i32, i32) {
    %c0_i32 = arith.constant 0 : i32
    %c0_i32_0 = arith.constant 0 : i32
    %c0_i32_1 = arith.constant 0 : i32
    return %c0_i32, %c0_i32_0 : i32, i32
  }
  func.func @transform_5(%arg0: i32) -> (i32, i32) {
    %c0_i32 = arith.constant 0 : i32
    %c0_i32_0 = arith.constant 0 : i32
    return %arg0, %c0_i32 : i32, i32
  }
}

</mosaic_0001>

<bundles_post_ra>
// kernel: tpu_custom_call.1
= control target key start
LH: loop header
LB: loop body
LE: loop exit
PB: predicated region body
PF: predicated region fallthrough
CT: control target
= control target key end

     0   :  { %10 = vsyncpa [#allocation3], 0  ;;  %v293_v2 = vmov 0.0|0.0   ;;  %vm294_vm0 = vmmov 0   ;;  %v295_v6 = vmov 0.0   ;;  %vm31_vm1 = vcmask 130048   ;;  %s371_s0 = inlined_call_operand.vmem [shape: f32[2,16], index: 0, kind: input, shape index: {}]   ;;  %s372_s1 = inlined_call_operand.vmem [shape: f32[16,32], index: 1, kind: input, shape index: {}]   ;;  %s373_s2 = inlined_call_operand.vmem [shape: f32[1,32], index: 2, kind: input, shape index: {}]   ;;  %s374_s3 = inlined_call_operand.vmem [shape: f32[32,8], index: 3, kind: input, shape index: {}]   ;;  %s375_s4 = inlined_call_operand.vmem [shape: f32[1,8], index: 4, kind: input, shape index: {}]   ;;  %s376_s5 = inlined_call_operand.hbm [shape: f32[2,8], index: 5, kind: output, shape index: {}]  }
   0x1   :  { %v22_v0 = vld [vmem:[%s372_s1] sm:$0xff]  ;;  %v23_v1 = vld [vmem:[%s372_s1 + $0x8] sm:$0xff]  ;;  %250 = vmatprep.subr.bf16.mxu0 %v293_v2  ;;  %253 = vmatprep.subr.bf16.mxu1 %v293_v2  ;;  %v108_v9 = vld [vmem:[%s374_s3 + $0x10] sm:$0xff]  ;;  %vm117_vm2 = vcmask 261120   ;;  %vm191_vm3 = vcmask 64512  }
   0x2   :  { %v251_v3 = vpack.c.bf16 %v23_v1, %v22_v0  ;;  %v106_v4 = vld [vmem:[%s374_s3] sm:$0xff]  ;;  %v107_v5 = vld [vmem:[%s374_s3 + $0x8] sm:$0xff]  ;;  %236 = vmatprep.mubr.msk.f32.mxu0 %vm294_vm0, %v295_v6  ;;  %247 = vmatprep.mubr.msk.f32.mxu1 %vm294_vm0, %v295_v6  ;;  %v109_v10 = vld [vmem:[%s374_s3 + $0x18] sm:$0xff] }
   0x3   :  { %v254_v7 = vpack.c.bf16 %v107_v5, %v106_v4  ;;  %v21_v8 = vld [vmem:[%s371_s0] sm:$0xff]  ;;  %v257_v11 = vpack.c.bf16 %v109_v10, %v108_v9 }
   0x4   :  { %252 = vmatpush3.bf16.msra.mxu0 %v251_v3  ;;  %v220_v12 = vld [vmem:[%s373_s2] ss:$0 sm:$0xff] }
   0x5   :  { %255 = vmatpush3.bf16.msra.mxu1 %v254_v7  ;;  %v222_v17 = vld [vmem:[%s375_s4] ss:$0 sm:$0xff] }
   0x6   :  { %256 = vmatprep.subr.bf16.mxu1 %v293_v2 }
   0x7   :  { %237 = vmatmul.mubr.msk.f32.vlgmr.msra.gmra.mrb[0].mxu0 %vm31_vm1, %v21_v8 }
   0x9   :  { %258 = vmatpush3.bf16.msra.mxu1 %v257_v11 }
  0xda   :  { %v101_v13 = vpop.f32.mrb[0].mxu0 }
  0xdb   :  { %v102_v14 = vadd.f32 %v220_v12, %v101_v13  ;;  %v238_v15 = vpop.f32.mrb[1].mxu0 }
  0xdd   :  { %v105_v16 = vmax.f32 %v102_v14, 0.0 }
  0xdf   :  { %248 = vmatmul.mubr.msk.f32.vlgmr.msra.gmra.mrb[0].mxu1 %vm117_vm2, %v105_v16 }
 0x1b2   :  { %v187_v18 = vpop.f32.mrb[0].mxu1 }
 0x1b3   :  { %v188_v19 = vadd.f32 %v222_v17, %v187_v18  ;;  %v249_v20 = vpop.f32.mrb[1].mxu1 }
 0x1b5   :  { %v192_v21 = vsel %vm191_vm3, %v188_v19, -inf }
 0x1b6   :  { %193 = vmax.xlane.f32.xlu0 %v192_v21 }
 0x243   :  { %v194_v22 = vpop.xlane.xlu0 %193 }
 0x244   :  { %v195_v23 = vsub.f32 %v188_v19, %v194_v22 }
 0x246   :  { %v196_v24 = vmul.f32 1.442695, %v195_v23 }
 0x248   :  { %265 = vpow2.f32 %v196_v24 }
 0x252   :  { %v266_v25 = vpop.eup %265 }
 0x253   :  { %v198_v26 = vsel %vm191_vm3, %v266_v25, 0.0 }
 0x254   :  { %199 = vadd.xlane.f32.xlu0 %v198_v26 }
 0x2e1   :  { %v200_v27 = vpop.xlane.xlu0 %199 }
 0x2e2   :  { %267 = vrcp.f32 %v200_v27 }
 0x2ec   :  { %v268_v28 = vpop.eup %267 }
 0x2ed   :  { %v202_v29 = vmul.f32 %v268_v28, %v266_v25 }
 0x2ef   :  { %203 = vst.msk [vmem:[#allocation2] sm:$0xff] %vm191_vm3, %v202_v29 }
 0x2f0   :  { %208 = vsyncadd [#allocation3], 96  ;;  %s296_s2 = smov [#allocation2]  }
 0x2f1   :  { %s209_s3 = sshll.u32 %s296_s2, 4  ;;  %s210_s3 = int_to_ptr.vmem [resolvable:$true] %s209_s3 }
 0x2f2   :  { %s269_s4 = scalar_lea.vmem %s210_s3, 32  ;;  %s273_s9 = scalar_lea.vmem %s210_s3, 128 }
 0x2f3   :  { %p270_p0 = scmp.ne.s32.totalorder %s210_s3, %s269_s4  ;;  %p274_p1 = scmp.lt.s32.totalorder %s210_s3, %s210_s3 }
 0x2f4   :  { %p275_p2 = scmp.lt.s32.totalorder %s273_s9, %s269_s4 }
 0x2f6   :  { %p276_p3 = por %p275_p2, %p274_p1 }
 0x2f8   :  { %p277_p4 = pnand %p276_p3, %p270_p0 }
 0x2fa   :  { %280 = shalt.err (!%p277_p4)
}
 0x2fb   :  { %s281_s12 = scalar_lea.hbm %s376_s5, 32 }
 0x2fc   :  { %p282_p5 = scmp.ne.s32.totalorder %s376_s5, %s281_s12  ;;  %p285_p6 = scmp.lt.u32.totalorder %s281_s12, %s376_s5 }
 0x2fe   :  { %p287_p7 = pnand %p285_p6, %p282_p5 }
 0x300   :  { %290 = shalt.err (!%p287_p7)
}
 0x301   :  { %s297_s17 = smov 32   ;;  %s298_s18 = smov 2  }
 0x302   :  { %215 = dma.vmem_to_hbm [thread:$0]  %s210_s3, 32, %s376_s5, [#allocation3], %s297_s17, %s297_s17, %s298_s18  }
 0x303   :  { %291 = dma.done.wait [#allocation3], 128  }
 0x304   :  { %292 = vsyncadd [#allocation3], 4294967168 }
 0x305   :  { %219 = vsyncpa [#allocation3], 1 }

</bundles_post_ra>
